<compile_context>
chip_gen: v7x
topology: tpu7x:2x2x1
jax: 0.10.0
libtpu: 0.0.40
codegen_flags: <defaults>
</compile_context>

<pallas_src>
import math

import jax
import jax.numpy as jnp
from jax.experimental import pallas as pl
from jax.experimental.pallas import tpu as pltpu


def _round_up(x, m):
    return ((x + m - 1) // m) * m


def mlp_kernel(x_ref, w1_ref, b1_ref, w2_ref, b2_ref, o_ref):
    # Hidden layer: bf16 MXU matmul with f32 accumulation, then f32 bias+ReLU.
    h = jnp.dot(x_ref[...], w1_ref[...], preferred_element_type=jnp.float32)
    h = jnp.maximum(h + b1_ref[...], 0.0)          # b1 (1, hidden) broadcasts over batch

    # Logits layer (output padded to a lane-dense 128-wide slab) + sigmoid in f32.
    logits = jnp.dot(h.astype(jnp.bfloat16), w2_ref[...],
                     preferred_element_type=jnp.float32)
    logits = logits + b2_ref[...]                  # b2 (1, out_pad) broadcasts over batch
    o_ref[...] = jax.nn.sigmoid(logits).astype(o_ref.dtype)


def simple_classification_mlp(x, w1, b1, w2, b2, *, tile_b=None):
    """x: [B, input_size]; w1: [input_size, hidden]; b1: [1, hidden];
    w2: [hidden, output]; b2: [1, output]. Returns sigmoid probabilities [B, output] (f32)."""
    batch, input_size = x.shape
    hidden = w1.shape[1]
    out_size = w2.shape[1]

    # Lane-dense padded output width (multiple of 128).
    out_pad = _round_up(max(out_size, 128), 128)

    # Batch tiling: 256-wide M tiles once the batch is large enough (MXU width on
    # v6e/v7x); for tiny batches just round up to the 8-sublane minimum.
    if tile_b is None:
        tile_b = 256 if batch >= 256 else _round_up(batch, 8)
    b_pad = _round_up(batch, tile_b)
    num_b_tiles = b_pad // tile_b

    # Wrapper-side casts / padding (bf16 only for matmul operands; biases stay f32).
    x_p = x
    if b_pad != batch:
        x_p = jnp.pad(x_p, ((0, b_pad - batch), (0, 0)))
    x_p = x_p.astype(jnp.bfloat16)
    w1_b = w1.astype(jnp.bfloat16)
    b1_f = b1.astype(jnp.float32)
    w2_p = jnp.pad(w2, ((0, 0), (0, out_pad - out_size))).astype(jnp.bfloat16)
    b2_p = jnp.pad(b2.astype(jnp.float32), ((0, 0), (0, out_pad - out_size)))

    out_padded = pl.pallas_call(
        mlp_kernel,
        out_shape=jax.ShapeDtypeStruct((b_pad, out_pad), jnp.float32),
        grid=(num_b_tiles,),
        in_specs=[
            pl.BlockSpec((tile_b, input_size), lambda i: (i, 0)),   # x: tiled over batch
            pl.BlockSpec((input_size, hidden), lambda i: (0, 0)),   # w1: VMEM-resident
            pl.BlockSpec((1, hidden), lambda i: (0, 0)),            # b1: VMEM-resident
            pl.BlockSpec((hidden, out_pad), lambda i: (0, 0)),      # w2: VMEM-resident
            pl.BlockSpec((1, out_pad), lambda i: (0, 0)),           # b2: VMEM-resident
        ],
        out_specs=pl.BlockSpec((tile_b, out_pad), lambda i: (i, 0)),
        compiler_params=pltpu.CompilerParams(
            dimension_semantics=("parallel",),
        ),
    )(x_p, w1_b, b1_f, w2_p, b2_p)

    return out_padded[:batch, :out_size]


def init_linear_params(key, fan_in, fan_out, dtype=jnp.float32):
    """Deterministic init mirroring nn.Linear's default U(-1/sqrt(fan_in), +1/sqrt(fan_in)).
    Weight returned pre-transposed as [fan_in, fan_out]."""
    kw, kb = jax.random.split(key)
    bound = 1.0 / math.sqrt(fan_in)
    w = jax.random.uniform(kw, (fan_in, fan_out), dtype, minval=-bound, maxval=bound)
    b = jax.random.uniform(kb, (1, fan_out), dtype, minval=-bound, maxval=bound)
    return w, b


if __name__ == "__main__":
    # Module defaults: input_size=28*28=784, hidden_size=512, hidden_layers=1, output_size=10.
    batch = 4
    input_size = 28 * 28
    hidden_size = 512
    output_size = 10
    dtype = jnp.float32

    key = jax.random.PRNGKey(0)
    kx, k1, k2 = jax.random.split(key, 3)

    x = jax.random.normal(kx, (batch, input_size), dtype)
    w1, b1 = init_linear_params(k1, input_size, hidden_size, dtype)
    w2, b2 = init_linear_params(k2, hidden_size, output_size, dtype)

    out = simple_classification_mlp(x, w1, b1, w2, b2)
    out = jax.block_until_ready(out)
    assert out.shape == (batch, output_size)

    # Reference 1: same bf16-operand / f32-accumulate pipeline (tight tolerance).
    h_bf = jnp.maximum(
        jnp.dot(x.astype(jnp.bfloat16), w1.astype(jnp.bfloat16),
                preferred_element_type=jnp.float32) + b1, 0.0)
    logits_bf = jnp.dot(h_bf.astype(jnp.bfloat16), w2.astype(jnp.bfloat16),
                        preferred_element_type=jnp.float32) + b2
    ref_bf = jax.nn.sigmoid(logits_bf)
    assert jnp.allclose(out, ref_bf, atol=1e-3, rtol=1e-3)

    # Reference 2: pure f32 forward pass (loose tolerance for bf16 quantization).
    h_f32 = jnp.maximum(x @ w1 + b1, 0.0)
    ref_f32 = jax.nn.sigmoid(h_f32 @ w2 + b2)
    assert jnp.allclose(out, ref_f32, atol=3e-2, rtol=3e-2)

    print("KERNEL_OK")
</pallas_src>

<mosaic_0001>
module attributes {stable_mosaic.version = 11 : i64} {
  func.func @mlp_kernel(%arg0: i32, %arg1: memref<8x784xbf16, #tpu.memory_space<vmem>>, %arg2: memref<784x512xbf16, #tpu.memory_space<vmem>>, %arg3: memref<1x512xf32, #tpu.memory_space<vmem>>, %arg4: memref<512x128xbf16, #tpu.memory_space<vmem>>, %arg5: memref<1x128xf32, #tpu.memory_space<vmem>>, %arg6: memref<8x128xf32, #tpu.memory_space<vmem>>) attributes {dimension_semantics = [#tpu.dimension_semantics<parallel>], iteration_bounds = array<i64: 1>, scalar_prefetch = 0 : i64, scratch_operands = 0 : i64, tpu.core_type = #tpu.core_type<tc>, window_params = [{transform_indices = @transform_0, window_bounds = array<i64: 8, 784>}, {pipeline_mode = #tpu.pipeline_mode<synchronous>, transform_indices = @transform_1, window_bounds = array<i64: 784, 512>}, {pipeline_mode = #tpu.pipeline_mode<synchronous>, transform_indices = @transform_2, window_bounds = array<i64: 1, 512>}, {pipeline_mode = #tpu.pipeline_mode<synchronous>, transform_indices = @transform_3, window_bounds = array<i64: 512, 128>}, {pipeline_mode = #tpu.pipeline_mode<synchronous>, transform_indices = @transform_4, window_bounds = array<i64: 1, 128>}, {transform_indices = @transform_5, window_bounds = array<i64: 8, 128>}]} {
    %c0 = arith.constant 0 : index
    %c0_0 = arith.constant 0 : index
    %0 = vector.load %arg1[%c0, %c0_0] : memref<8x784xbf16, #tpu.memory_space<vmem>>, vector<8x784xbf16>
    %c0_1 = arith.constant 0 : index
    %c0_2 = arith.constant 0 : index
    %1 = vector.load %arg2[%c0_1, %c0_2] : memref<784x512xbf16, #tpu.memory_space<vmem>>, vector<784x512xbf16>
    %cst = arith.constant dense<0.000000e+00> : vector<8x512xf32>
    %2 = tpu.matmul %0, %1, %cst {dimension_numbers = #tpu.dot_dimension_numbers<[1], [0], [0], [1], [0, 0, 1, 1], [], []>} : vector<8x784xbf16>, vector<784x512xbf16>, vector<8x512xf32> -> vector<8x512xf32>
    %c0_3 = arith.constant 0 : index
    %c0_4 = arith.constant 0 : index
    %3 = vector.load %arg3[%c0_3, %c0_4] : memref<1x512xf32, #tpu.memory_space<vmem>>, vector<1x512xf32>
    %4 = vector.broadcast %3 : vector<1x512xf32> to vector<8x512xf32>
    %5 = arith.addf %2, %4 : vector<8x512xf32>
    %cst_5 = arith.constant 0.000000e+00 : f32
    %6 = vector.broadcast %cst_5 : f32 to vector<8x512xf32>
    %7 = arith.maximumf %5, %6 : vector<8x512xf32>
    %8 = arith.truncf %7 : vector<8x512xf32> to vector<8x512xbf16>
    %c0_6 = arith.constant 0 : index
    %c0_7 = arith.constant 0 : index
    %9 = vector.load %arg4[%c0_6, %c0_7] : memref<512x128xbf16, #tpu.memory_space<vmem>>, vector<512x128xbf16>
    %cst_8 = arith.constant dense<0.000000e+00> : vector<8x128xf32>
    %10 = tpu.matmul %8, %9, %cst_8 {dimension_numbers = #tpu.dot_dimension_numbers<[1], [0], [0], [1], [0, 0, 1, 1], [], []>} : vector<8x512xbf16>, vector<512x128xbf16>, vector<8x128xf32> -> vector<8x128xf32>
    %c0_9 = arith.constant 0 : index
    %c0_10 = arith.constant 0 : index
    %11 = vector.load %arg5[%c0_9, %c0_10] : memref<1x128xf32, #tpu.memory_space<vmem>>, vector<1x128xf32>
    %12 = vector.broadcast %11 : vector<1x128xf32> to vector<8x128xf32>
    %13 = arith.addf %10, %12 : vector<8x128xf32>
    %14 = arith.negf %13 : vector<8x128xf32>
    %15 = math.exp %14 : vector<8x128xf32>
    %cst_11 = arith.constant 1.000000e+00 : f32
    %16 = vector.broadcast %cst_11 : f32 to vector<8x128xf32>
    %17 = arith.addf %16, %15 : vector<8x128xf32>
    %18 = arith.divf %16, %17 : vector<8x128xf32>
    %c0_12 = arith.constant 0 : index
    %c0_13 = arith.constant 0 : index
    %19 = vector.load %arg6[%c0_12, %c0_13] : memref<8x128xf32, #tpu.memory_space<vmem>>, vector<8x128xf32>
    tpu.vector_store %arg6[%c0_12, %c0_13], %18 {strides = array<i32>} : memref<8x128xf32, #tpu.memory_space<vmem>>, vector<8x128xf32>,
    return
  }
  func.func @transform_0(%arg0: i32) -> (i32, i32) {
    %c0_i32 = arith.constant 0 : i32
    %c0_i32_0 = arith.constant 0 : i32
    return %arg0, %c0_i32 : i32, i32
  }
  func.func @transform_1(%arg0: i32) -> (i32, i32) {
    %c0_i32 = arith.constant 0 : i32
    %c0_i32_0 = arith.constant 0 : i32
    %c0_i32_1 = arith.constant 0 : i32
    return %c0_i32, %c0_i32_0 : i32, i32
  }
  func.func @transform_2(%arg0: i32) -> (i32, i32) {
    %c0_i32 = arith.constant 0 : i32
    %c0_i32_0 = arith.constant 0 : i32
    %c0_i32_1 = arith.constant 0 : i32
    return %c0_i32, %c0_i32_0 : i32, i32
  }
  func.func @transform_3(%arg0: i32) -> (i32, i32) {
    %c0_i32 = arith.constant 0 : i32
    %c0_i32_0 = arith.constant 0 : i32
    %c0_i32_1 = arith.constant 0 : i32
    return %c0_i32, %c0_i32_0 : i32, i32
  }
  func.func @transform_4(%arg0: i32) -> (i32, i32) {
    %c0_i32 = arith.constant 0 : i32
    %c0_i32_0 = arith.constant 0 : i32
    %c0_i32_1 = arith.constant 0 : i32
    return %c0_i32, %c0_i32_0 : i32, i32
  }
  func.func @transform_5(%arg0: i32) -> (i32, i32) {
    %c0_i32 = arith.constant 0 : i32
    %c0_i32_0 = arith.constant 0 : i32
    return %arg0, %c0_i32 : i32, i32
  }
}

</mosaic_0001>

<bundles_post_ra>
// kernel: tpu_custom_call.1
= control target key start
LH: loop header
LB: loop body
LE: loop exit
PB: predicated region body
PF: predicated region fallthrough
CT: control target
= control target key end

     0   :  { %10 = vsyncpa [#allocation3], 0  ;;  %s2849_s0 = inlined_call_operand.hbm [shape: bf16[8,784], index: 0, kind: input, shape index: {}]   ;;  %s2850_s1 = inlined_call_operand.hbm [shape: bf16[784,512], index: 1, kind: input, shape index: {}]   ;;  %s2851_s2 = inlined_call_operand.vmem [shape: f32[1,512], index: 2, kind: input, shape index: {}]   ;;  %s2852_s3 = inlined_call_operand.hbm [shape: bf16[512,128], index: 3, kind: input, shape index: {}]   ;;  %s2853_s4 = inlined_call_operand.vmem [shape: f32[1,128], index: 4, kind: input, shape index: {}]   ;;  %s2854_s5 = inlined_call_operand.hbm [shape: f32[8,128], index: 5, kind: output, shape index: {}]  }
   0x1   :  { %11 = vsyncpa [#allocation6], 0 }
   0x2   :  { %12 = vsyncpa [#allocation4], 0  ;;  %s2744_s18 = smov [#allocation5]   ;;  %s2650_s22 = scalar_lea.hbm %s2850_s1, 25088 }
   0x3   :  { %s28_s19 = sshll.u32 %s2744_s18, 4  ;;  %p2651_p0 = scmp.ne.s32.totalorder %s2850_s1, %s2650_s22  ;;  %s29_s19 = int_to_ptr.vmem [resolvable:$true] %s28_s19 }
   0x4   :  { %p2654_p1 = scmp.lt.u32.totalorder %s2650_s22, %s2850_s1 }
   0x6   :  { %p2656_p2 = pnand %p2654_p1, %p2651_p0 }
   0x8   :  { %2659 = shalt.err (!%p2656_p2)
}
   0x9   :  { %s2660_s27 = scalar_lea.vmem %s29_s19, 25088  ;;  %p2665_p4 = scmp.lt.s32.totalorder %s29_s19, %s29_s19 }
   0xa   :  { %p2661_p3 = scmp.ne.s32.totalorder %s29_s19, %s2660_s27  ;;  %p2666_p5 = scmp.lt.s32.totalorder %s2660_s27, %s2660_s27 }
   0xc   :  { %p2667_p6 = por %p2666_p5, %p2665_p4 }
   0xe   :  { %p2668_p7 = pnand %p2667_p6, %p2661_p3 }
  0x10   :  { %2671 = shalt.err (!%p2668_p7)
}
  0x11   :  { %s2745_s28 = smov 256   ;;  %s2746_s29 = smov 16  }
  0x12   :  { %34 = dma.hbm_to_vmem [thread:$0]  %s2850_s1, 25088, %s29_s19, [#allocation6], %s2745_s28, %s2745_s28, %s2746_s29  }
  0x13   :  { %s2747_s7 = smov [#allocation2]   ;;  %s2748_s9 = smov [#allocation7]  }
  0x14   :  { %s19_s8 = sshll.u32 %s2747_s7, 4  ;;  %s42_s10 = sshll.u32 %s2748_s9, 4  ;;  %s20_s8 = int_to_ptr.vmem [resolvable:$true] %s19_s8  ;;  %s43_s10 = int_to_ptr.vmem [resolvable:$true] %s42_s10 }
  0x15   :  { %s2672_s13 = scalar_lea.hbm %s2849_s0, 448 }
  0x16   :  { %p2673_p8 = scmp.ne.s32.totalorder %s2849_s0, %s2672_s13  ;;  %p2676_p9 = scmp.lt.u32.totalorder %s2672_s13, %s2849_s0 }
  0x18   :  { %p2678_p10 = pnand %p2676_p9, %p2673_p8 }
  0x1a   :  { %2681 = shalt.err (!%p2678_p10)
}
  0x1b   :  { %s2682_s1 = scalar_lea.vmem %s20_s8, 448  ;;  %p2687_p12 = scmp.lt.s32.totalorder %s20_s8, %s20_s8 }
  0x1c   :  { %p2683_p11 = scmp.ne.s32.totalorder %s20_s8, %s2682_s1  ;;  %p2688_p13 = scmp.lt.s32.totalorder %s2682_s1, %s2682_s1 }
  0x1e   :  { %p2689_p0 = por %p2688_p13, %p2687_p12 }
  0x20   :  { %p2690_p1 = pnand %p2689_p0, %p2683_p11 }
  0x22   :  { %2693 = shalt.err (!%p2690_p1)
}
  0x23   :  { %22 = dma.hbm_to_vmem [thread:$0]  %s2849_s0, 448, %s20_s8, [#allocation3]  }
  0x24   :  { %s2694_s22 = scalar_lea.hbm %s2852_s3, 4096 }
  0x25   :  { %p2695_p2 = scmp.ne.s32.totalorder %s2852_s3, %s2694_s22  ;;  %p2698_p3 = scmp.lt.u32.totalorder %s2694_s22, %s2852_s3 }
  0x27   :  { %p2700_p4 = pnand %p2698_p3, %p2695_p2 }
  0x29   :  { %2703 = shalt.err (!%p2700_p4)
}
  0x2a   :  { %s2704_s27 = scalar_lea.vmem %s43_s10, 4096  ;;  %p2709_p6 = scmp.lt.s32.totalorder %s43_s10, %s43_s10 }
  0x2b   :  { %p2705_p5 = scmp.ne.s32.totalorder %s43_s10, %s2704_s27  ;;  %p2710_p7 = scmp.lt.s32.totalorder %s2704_s27, %s2704_s27 }
  0x2d   :  { %p2711_p8 = por %p2710_p7, %p2709_p6 }
  0x2f   :  { %p2712_p9 = pnand %p2711_p8, %p2705_p5 }
  0x31   :  { %2715 = shalt.err (!%p2712_p9)
}
  0x32   :  { %s2749_s0 = smov 64   ;;  %s2750_s28 = smov 4  }
  0x33   :  { %48 = dma.hbm_to_vmem [thread:$0]  %s2852_s3, 4096, %s43_s10, [#allocation6], %s2749_s0, %s2749_s0, %s2750_s28  }
  0x34   :  { %2738 = dma.done.wait [#allocation3], 448  }
  0x35   :  { %2739 = vsyncadd [#allocation3], 4294966848 }
  0x36   :  { %2740 = dma.done.wait [#allocation6], 29184  }
  0x37   :  { %2741 = vsyncadd [#allocation6], 4294938112  ;;  %v2313_v0 = vld [vmem:[#allocation5 + $0x4] ss:$16 sps:$4 sm:$0xff]   ;;  %v2315_v1 = vld [vmem:[#allocation5 + $0xc] ss:$16 sps:$4 sm:$0xff]  }
  0x38   :  { %1291 = vmatprep.subr.bf16.mxu0 %v2313_v0  ;;  %v2317_v2 = vld [vmem:[#allocation5] ss:$16 sps:$4 sm:$0xff]   ;;  %v2318_v3 = vld [vmem:[#allocation5 + $0x8] ss:$16 sps:$4 sm:$0xff]   ;;  %1455 = vmatprep.subr.bf16.mxu1 %v2315_v1  ;;  %v2319_v4 = vld [vmem:[#allocation5 + $0x24] ss:$16 sps:$4 sm:$0xff]  }
  0x39   :  { %1292 = vmatpush1.bf16.msra.mxu0 %v2317_v2  ;;  %1456 = vmatpush1.bf16.msra.mxu1 %v2318_v3  ;;  %v2321_v5 = vld [vmem:[#allocation5 + $0x2c] ss:$16 sps:$4 sm:$0xff]   ;;  %v2323_v6 = vld [vmem:[#allocation5 + $0x20] ss:$16 sps:$4 sm:$0xff]   ;;  %v2324_v7 = vld [vmem:[#allocation5 + $0x28] ss:$16 sps:$4 sm:$0xff]  }
  0x3a   :  { %1293 = vmatprep.subr.bf16.mxu0 %v2319_v4  ;;  %1457 = vmatprep.subr.bf16.mxu1 %v2321_v5  ;;  %v2325_v8 = vld [vmem:[#allocation5 + $0x44] ss:$16 sps:$4 sm:$0xff]   ;;  %v2327_v9 = vld [vmem:[#allocation5 + $0x4c] ss:$16 sps:$4 sm:$0xff]   ;;  %v2329_v10 = vld [vmem:[#allocation5 + $0x40] ss:$16 sps:$4 sm:$0xff]  }
  0x3b   :  { %v2330_v11 = vld [vmem:[#allocation5 + $0x48] ss:$16 sps:$4 sm:$0xff]   ;;  %v2331_v12 = vld [vmem:[#allocation5 + $0x64] ss:$16 sps:$4 sm:$0xff]   ;;  %v2333_v13 = vld [vmem:[#allocation5 + $0x6c] ss:$16 sps:$4 sm:$0xff]  }
  0x3c   :  { %v2335_v14 = vld [vmem:[#allocation5 + $0x60] ss:$16 sps:$4 sm:$0xff]   ;;  %v2336_v15 = vld [vmem:[#allocation5 + $0x68] ss:$16 sps:$4 sm:$0xff]   ;;  %v2337_v16 = vld [vmem:[#allocation5 + $0x84] ss:$16 sps:$4 sm:$0xff]  }
  0x3d   :  { %1294 = vmatpush1.bf16.msra.mxu0 %v2323_v6  ;;  %1458 = vmatpush1.bf16.msra.mxu1 %v2324_v7  ;;  %v2339_v17 = vld [vmem:[#allocation5 + $0x8c] ss:$16 sps:$4 sm:$0xff]   ;;  %v2341_v18 = vld [vmem:[#allocation5 + $0x80] ss:$16 sps:$4 sm:$0xff]   ;;  %v2342_v19 = vld [vmem:[#allocation5 + $0x88] ss:$16 sps:$4 sm:$0xff]  }
  0x3e   :  { %1295 = vmatprep.subr.bf16.mxu0 %v2325_v8  ;;  %1459 = vmatprep.subr.bf16.mxu1 %v2327_v9  ;;  %v2343_v20 = vld [vmem:[#allocation5 + $0xa4] ss:$16 sps:$4 sm:$0xff]   ;;  %v2345_v21 = vld [vmem:[#allocation5 + $0xac] ss:$16 sps:$4 sm:$0xff]   ;;  %v2347_v22 = vld [vmem:[#allocation5 + $0xa0] ss:$16 sps:$4 sm:$0xff]  }
  0x3f   :  { %v2348_v23 = vld [vmem:[#allocation5 + $0xa8] ss:$16 sps:$4 sm:$0xff]   ;;  %v2349_v24 = vld [vmem:[#allocation5 + $0xc4] ss:$16 sps:$4 sm:$0xff]   ;;  %v2351_v25 = vld [vmem:[#allocation5 + $0xcc] ss:$16 sps:$4 sm:$0xff]  }
  0x40   :  { %v2353_v26 = vld [vmem:[#allocation5 + $0xc0] ss:$16 sps:$4 sm:$0xff]   ;;  %v2354_v27 = vld [vmem:[#allocation5 + $0xc8] ss:$16 sps:$4 sm:$0xff]   ;;  %v2355_v28 = vld [vmem:[#allocation5 + $0xe4] ss:$16 sps:$4 sm:$0xff]  }
  0x41   :  { %1296 = vmatpush1.bf16.msra.mxu0 %v2329_v10  ;;  %1460 = vmatpush1.bf16.msra.mxu1 %v2330_v11  ;;  %v2357_v29 = vld [vmem:[#allocation5 + $0xec] ss:$16 sps:$4 sm:$0xff]   ;;  %v2359_v30 = vld [vmem:[#allocation5 + $0xe0] ss:$16 sps:$4 sm:$0xff]   ;;  %v2360_v31 = vld [vmem:[#allocation5 + $0xe8] ss:$16 sps:$4 sm:$0xff]  }
  0x42   :  { %1297 = vmatprep.subr.bf16.mxu0 %v2331_v12  ;;  %1461 = vmatprep.subr.bf16.mxu1 %v2333_v13  ;;  %v2361_v32 = vld [vmem:[#allocation5 + $0x104] ss:$16 sps:$4 sm:$0xff]   ;;  %v2363_v33 = vld [vmem:[#allocation5 + $0x10c] ss:$16 sps:$4 sm:$0xff]   ;;  %v2365_v34 = vld [vmem:[#allocation5 + $0x100] ss:$16 sps:$4 sm:$0xff]  }
  0x43   :  { %v2366_v35 = vld [vmem:[#allocation5 + $0x108] ss:$16 sps:$4 sm:$0xff]   ;;  %v2367_v36 = vld [vmem:[#allocation5 + $0x124] ss:$16 sps:$4 sm:$0xff]   ;;  %v2369_v37 = vld [vmem:[#allocation5 + $0x12c] ss:$16 sps:$4 sm:$0xff]  }
  0x44   :  { %v2371_v38 = vld [vmem:[#allocation5 + $0x120] ss:$16 sps:$4 sm:$0xff]   ;;  %v2372_v39 = vld [vmem:[#allocation5 + $0x128] ss:$16 sps:$4 sm:$0xff]   ;;  %v2373_v40 = vld [vmem:[#allocation5 + $0x144] ss:$16 sps:$4 sm:$0xff]  }
  0x45   :  { %1298 = vmatpush1.bf16.msra.mxu0 %v2335_v14  ;;  %1462 = vmatpush1.bf16.msra.mxu1 %v2336_v15  ;;  %v2375_v41 = vld [vmem:[#allocation5 + $0x14c] ss:$16 sps:$4 sm:$0xff]   ;;  %v2377_v42 = vld [vmem:[#allocation5 + $0x140] ss:$16 sps:$4 sm:$0xff]   ;;  %v2378_v43 = vld [vmem:[#allocation5 + $0x148] ss:$16 sps:$4 sm:$0xff]  }
  0x46   :  { %1299 = vmatprep.subr.bf16.mxu0 %v2337_v16  ;;  %1463 = vmatprep.subr.bf16.mxu1 %v2339_v17  ;;  %v2379_v44 = vld [vmem:[#allocation5 + $0x164] ss:$16 sps:$4 sm:$0xff]   ;;  %v2381_v45 = vld [vmem:[#allocation5 + $0x16c] ss:$16 sps:$4 sm:$0xff]   ;;  %v2383_v47 = vld [vmem:[#allocation5 + $0x160] ss:$16 sps:$4 sm:$0xff]  }
  0x47   :  { %v61_v46 = vld [vmem:[#allocation2] sm:$0xff]  ;;  %v2387_v51 = vld [vmem:[#allocation5 + $0x18c] ss:$16 sps:$4 sm:$0xff]   ;;  %v2389_v52 = vld [vmem:[#allocation5 + $0x180] ss:$16 sps:$4 sm:$0xff]   ;;  %vm1287_vm0 = vcmask 130048  }
  0x48   :  { %v1994_v48 = vcombine.high %v61_v46, %v61_v46  ;;  %v2384_v49 = vld [vmem:[#allocation5 + $0x168] ss:$16 sps:$4 sm:$0xff]   ;;  %v2385_v50 = vld [vmem:[#allocation5 + $0x184] ss:$16 sps:$4 sm:$0xff]   ;;  %v2393_v55 = vld [vmem:[#allocation5 + $0x1ac] ss:$16 sps:$4 sm:$0xff]   ;;  %v1993_v4 = vcombine.low %v61_v46, %v61_v46 }
  0x49   :  { %1300 = vmatpush1.bf16.msra.mxu0 %v2341_v18  ;;  %1464 = vmatpush1.bf16.msra.mxu1 %v2342_v19  ;;  %v2390_v53 = vld [vmem:[#allocation5 + $0x188] ss:$16 sps:$4 sm:$0xff]   ;;  %v2391_v54 = vld [vmem:[#allocation5 + $0x1a4] ss:$16 sps:$4 sm:$0xff]   ;;  %v2395_v56 = vld [vmem:[#allocation5 + $0x1a0] ss:$16 sps:$4 sm:$0xff]  }
  0x4a   :  { %1301 = vmatprep.subr.bf16.mxu0 %v2343_v20  ;;  %1465 = vmatprep.subr.bf16.mxu1 %v2345_v21  ;;  %v2396_v57 = vld [vmem:[#allocation5 + $0x1a8] ss:$16 sps:$4 sm:$0xff]   ;;  %v2397_v58 = vld [vmem:[#allocation5 + $0x1c4] ss:$16 sps:$4 sm:$0xff]   ;;  %v2399_v59 = vld [vmem:[#allocation5 + $0x1cc] ss:$16 sps:$4 sm:$0xff]  }
  0x4b   :  { %1323 = vmatprep.mubr.bf16.mxu0 %v1994_v48  ;;  %1487 = vmatprep.mubr.bf16.mxu1 %v1994_v48  ;;  %v2401_v60 = vld [vmem:[#allocation5 + $0x1c0] ss:$16 sps:$4 sm:$0xff]   ;;  %v2402_v61 = vld [vmem:[#allocation5 + $0x1c8] ss:$16 sps:$4 sm:$0xff]   ;;  %v2403_v62 = vld [vmem:[#allocation5 + $0x1e4] ss:$16 sps:$4 sm:$0xff]  }
  0x4c   :  { %v2405_v63 = vld [vmem:[#allocation5 + $0x1ec] ss:$16 sps:$4 sm:$0xff]   ;;  %v2407_v0 = vld [vmem:[#allocation5 + $0x1e0] ss:$16 sps:$4 sm:$0xff]   ;;  %v2408_v1 = vld [vmem:[#allocation5 + $0x1e8] ss:$16 sps:$4 sm:$0xff]  }
  0x4d   :  { %1302 = vmatpush1.bf16.msra.mxu0 %v2347_v22  ;;  %1466 = vmatpush1.bf16.msra.mxu1 %v2348_v23  ;;  %v2413_v2 = vld [vmem:[#allocation5 + $0x204] ss:$16 sps:$4 sm:$0xff]   ;;  %v2416_v3 = vld [vmem:[#allocation5 + $0x20c] ss:$16 sps:$4 sm:$0xff]   ;;  %v2411_v5 = vld [vmem:[#allocation5 + $0x200] ss:$16 sps:$4 sm:$0xff]  }
  0x4e   :  { %1303 = vmatprep.subr.bf16.mxu0 %v2349_v24  ;;  %1467 = vmatprep.subr.bf16.mxu1 %v2351_v25  ;;  %v2414_v6 = vld [vmem:[#allocation5 + $0x208] ss:$16 sps:$4 sm:$0xff]   ;;  %v2419_v7 = vld [vmem:[#allocation5 + $0x224] ss:$16 sps:$4 sm:$0xff]   ;;  %v2422_v8 = vld [vmem:[#allocation5 + $0x22c] ss:$16 sps:$4 sm:$0xff]  }
  0x4f   :  { %v2417_v9 = vld [vmem:[#allocation5 + $0x220] ss:$16 sps:$4 sm:$0xff]   ;;  %v2420_v10 = vld [vmem:[#allocation5 + $0x228] ss:$16 sps:$4 sm:$0xff]   ;;  %v2425_v11 = vld [vmem:[#allocation5 + $0x244] ss:$16 sps:$4 sm:$0xff]  }
  0x50   :  { %v2428_v12 = vld [vmem:[#allocation5 + $0x24c] ss:$16 sps:$4 sm:$0xff]   ;;  %v2423_v13 = vld [vmem:[#allocation5 + $0x240] ss:$16 sps:$4 sm:$0xff]   ;;  %v2426_v14 = vld [vmem:[#allocation5 + $0x248] ss:$16 sps:$4 sm:$0xff]  }
  0x51   :  { %1304 = vmatpush1.bf16.msra.mxu0 %v2353_v26  ;;  %1468 = vmatpush1.bf16.msra.mxu1 %v2354_v27  ;;  %v2431_v15 = vld [vmem:[#allocation5 + $0x264] ss:$16 sps:$4 sm:$0xff]   ;;  %v2434_v16 = vld [vmem:[#allocation5 + $0x26c] ss:$16 sps:$4 sm:$0xff]   ;;  %v2429_v17 = vld [vmem:[#allocation5 + $0x260] ss:$16 sps:$4 sm:$0xff]  }
  0x52   :  { %1305 = vmatprep.subr.bf16.mxu0 %v2355_v28  ;;  %1469 = vmatprep.subr.bf16.mxu1 %v2357_v29  ;;  %v2432_v18 = vld [vmem:[#allocation5 + $0x268] ss:$16 sps:$4 sm:$0xff]   ;;  %v2437_v19 = vld [vmem:[#allocation5 + $0x284] ss:$16 sps:$4 sm:$0xff]   ;;  %v2440_v20 = vld [vmem:[#allocation5 + $0x28c] ss:$16 sps:$4 sm:$0xff]  }
  0x53   :  { %v2435_v21 = vld [vmem:[#allocation5 + $0x280] ss:$16 sps:$4 sm:$0xff]   ;;  %v2438_v22 = vld [vmem:[#allocation5 + $0x288] ss:$16 sps:$4 sm:$0xff]   ;;  %v2443_v23 = vld [vmem:[#allocation5 + $0x2a4] ss:$16 sps:$4 sm:$0xff]  }
  0x54   :  { %v2446_v24 = vld [vmem:[#allocation5 + $0x2ac] ss:$16 sps:$4 sm:$0xff]   ;;  %v2441_v25 = vld [vmem:[#allocation5 + $0x2a0] ss:$16 sps:$4 sm:$0xff]   ;;  %v2444_v26 = vld [vmem:[#allocation5 + $0x2a8] ss:$16 sps:$4 sm:$0xff]  }
  0x55   :  { %1306 = vmatpush1.bf16.msra.mxu0 %v2359_v30  ;;  %1470 = vmatpush1.bf16.msra.mxu1 %v2360_v31  ;;  %v2449_v27 = vld [vmem:[#allocation5 + $0x2c4] ss:$16 sps:$4 sm:$0xff]   ;;  %v2452_v28 = vld [vmem:[#allocation5 + $0x2cc] ss:$16 sps:$4 sm:$0xff]   ;;  %v2447_v31 = vld [vmem:[#allocation5 + $0x2c0] ss:$16 sps:$4 sm:$0xff]  }
  0x56   :  { %1307 = vmatprep.subr.bf16.mxu0 %v2361_v32  ;;  %1471 = vmatprep.subr.bf16.mxu1 %v2363_v33  ;;  %v2819_v29 = vld [vmem:[#allocation2 + $0x8] sm:$0xff]  ;;  %v2450_v32 = vld [vmem:[#allocation5 + $0x2c8] ss:$16 sps:$4 sm:$0xff]   ;;  %v2455_v33 = vld [vmem:[#allocation5 + $0x2e4] ss:$16 sps:$4 sm:$0xff]   ;;  %s2752_s8 = smov [#allocation8]  }
  0x57   :  { %v1996_v30 = vcombine.high %v2819_v29, %v2819_v29  ;;  %v2476_v46 = vld [vmem:[#allocation5 + $0x34c] ss:$16 sps:$4 sm:$0xff]   ;;  %v2474_v48 = vld [vmem:[#allocation5 + $0x348] ss:$16 sps:$4 sm:$0xff]   ;;  %s1983_s9 = sshll.u32 %s2752_s8, 4  ;;  %s1984_s9 = int_to_ptr.vmem [resolvable:$true] %s1983_s9 }
  0x58   :  { %p2721_p11 = scmp.lt.s32.totalorder %s1984_s9, %s1984_s9 }
  0x59   :  { %1308 = vmatpush1.bf16.msra.mxu0 %v2365_v34  ;;  %1472 = vmatpush1.bf16.msra.mxu1 %v2366_v35  ;;  %v2458_v34 = vld [vmem:[#allocation5 + $0x2ec] ss:$16 sps:$4 sm:$0xff]   ;;  %v2453_v35 = vld [vmem:[#allocation5 + $0x2e0] ss:$16 sps:$4 sm:$0xff]  }
  0x5a   :  { %1309 = vmatprep.subr.bf16.mxu0 %v2367_v36  ;;  %1473 = vmatprep.subr.bf16.mxu1 %v2369_v37  ;;  %v2456_v36 = vld [vmem:[#allocation5 + $0x2e8] ss:$16 sps:$4 sm:$0xff]   ;;  %v2461_v37 = vld [vmem:[#allocation5 + $0x304] ss:$16 sps:$4 sm:$0xff]  }
  0x5d   :  { %1310 = vmatpush1.bf16.msra.mxu0 %v2371_v38  ;;  %1474 = vmatpush1.bf16.msra.mxu1 %v2372_v39  ;;  %v2464_v38 = vld [vmem:[#allocation5 + $0x30c] ss:$16 sps:$4 sm:$0xff]   ;;  %v2459_v39 = vld [vmem:[#allocation5 + $0x300] ss:$16 sps:$4 sm:$0xff]  }
  0x5e   :  { %1311 = vmatprep.subr.bf16.mxu0 %v2373_v40  ;;  %1475 = vmatprep.subr.bf16.mxu1 %v2375_v41  ;;  %v2462_v40 = vld [vmem:[#allocation5 + $0x308] ss:$16 sps:$4 sm:$0xff]   ;;  %v2467_v41 = vld [vmem:[#allocation5 + $0x324] ss:$16 sps:$4 sm:$0xff]  }
  0x61   :  { %1312 = vmatpush1.bf16.msra.mxu0 %v2377_v42  ;;  %1476 = vmatpush1.bf16.msra.mxu1 %v2378_v43  ;;  %v2470_v42 = vld [vmem:[#allocation5 + $0x32c] ss:$16 sps:$4 sm:$0xff]   ;;  %v2465_v43 = vld [vmem:[#allocation5 + $0x320] ss:$16 sps:$4 sm:$0xff]  }
  0x62   :  { %1313 = vmatprep.subr.bf16.mxu0 %v2379_v44  ;;  %1477 = vmatprep.subr.bf16.mxu1 %v2381_v45  ;;  %v2468_v44 = vld [vmem:[#allocation5 + $0x328] ss:$16 sps:$4 sm:$0xff]   ;;  %v2473_v45 = vld [vmem:[#allocation5 + $0x344] ss:$16 sps:$4 sm:$0xff]  }
  0x65   :  { %1314 = vmatpush1.bf16.msra.mxu0 %v2383_v47  ;;  %1478 = vmatpush1.bf16.msra.mxu1 %v2384_v49  ;;  %v2471_v47 = vld [vmem:[#allocation5 + $0x340] ss:$16 sps:$4 sm:$0xff]   ;;  %v2479_v49 = vld [vmem:[#allocation5 + $0x364] ss:$16 sps:$4 sm:$0xff]  }
  0x66   :  { %1315 = vmatprep.subr.bf16.mxu0 %v2385_v50  ;;  %1479 = vmatprep.subr.bf16.mxu1 %v2387_v51  ;;  %v2482_v50 = vld [vmem:[#allocation5 + $0x36c] ss:$16 sps:$4 sm:$0xff]   ;;  %v2477_v51 = vld [vmem:[#allocation5 + $0x360] ss:$16 sps:$4 sm:$0xff]  }
  0x69   :  { %1316 = vmatpush1.bf16.msra.mxu0 %v2389_v52  ;;  %1480 = vmatpush1.bf16.msra.mxu1 %v2390_v53  ;;  %v2480_v52 = vld [vmem:[#allocation5 + $0x368] ss:$16 sps:$4 sm:$0xff]   ;;  %v2485_v53 = vld [vmem:[#allocation5 + $0x384] ss:$16 sps:$4 sm:$0xff]  }
  0x6a   :  { %1317 = vmatprep.subr.bf16.mxu0 %v2391_v54  ;;  %1481 = vmatprep.subr.bf16.mxu1 %v2393_v55  ;;  %v2488_v54 = vld [vmem:[#allocation5 + $0x38c] ss:$16 sps:$4 sm:$0xff]   ;;  %v2483_v55 = vld [vmem:[#allocation5 + $0x380] ss:$16 sps:$4 sm:$0xff]  }
  0x6d   :  { %1318 = vmatpush1.bf16.msra.mxu0 %v2395_v56  ;;  %1482 = vmatpush1.bf16.msra.mxu1 %v2396_v57  ;;  %v2486_v56 = vld [vmem:[#allocation5 + $0x388] ss:$16 sps:$4 sm:$0xff]   ;;  %v2491_v57 = vld [vmem:[#allocation5 + $0x3a4] ss:$16 sps:$4 sm:$0xff]  }
  0x6e   :  { %1319 = vmatprep.subr.bf16.mxu0 %v2397_v58  ;;  %1483 = vmatprep.subr.bf16.mxu1 %v2399_v59  ;;  %v2494_v58 = vld [vmem:[#allocation5 + $0x3ac] ss:$16 sps:$4 sm:$0xff]   ;;  %v2489_v59 = vld [vmem:[#allocation5 + $0x3a0] ss:$16 sps:$4 sm:$0xff]  }
  0x71   :  { %1320 = vmatpush1.bf16.msra.mxu0 %v2401_v60  ;;  %1484 = vmatpush1.bf16.msra.mxu1 %v2402_v61  ;;  %v2492_v60 = vld [vmem:[#allocation5 + $0x3a8] ss:$16 sps:$4 sm:$0xff]   ;;  %v2497_v61 = vld [vmem:[#allocation5 + $0x3c4] ss:$16 sps:$4 sm:$0xff]  }
  0x72   :  { %1321 = vmatprep.subr.bf16.mxu0 %v2403_v62  ;;  %1485 = vmatprep.subr.bf16.mxu1 %v2405_v63  ;;  %v2500_v62 = vld [vmem:[#allocation5 + $0x3cc] ss:$16 sps:$4 sm:$0xff]   ;;  %v2495_v63 = vld [vmem:[#allocation5 + $0x3c0] ss:$16 sps:$4 sm:$0xff]  }
  0x75   :  { %1322 = vmatpush1.bf16.msra.mxu0 %v2407_v0  ;;  %1486 = vmatpush1.bf16.msra.mxu1 %v2408_v1  ;;  %v2498_v0 = vld [vmem:[#allocation5 + $0x3c8] ss:$16 sps:$4 sm:$0xff]   ;;  %v2503_v1 = vld [vmem:[#allocation5 + $0x3e4] ss:$16 sps:$4 sm:$0xff]  }
  0x76   :  { %1332 = vmatprep.subr.bf16.mxu0 %v2413_v2  ;;  %1496 = vmatprep.subr.bf16.mxu1 %v2416_v3  ;;  %v2506_v2 = vld [vmem:[#allocation5 + $0x3ec] ss:$16 sps:$4 sm:$0xff]   ;;  %v2501_v3 = vld [vmem:[#allocation5 + $0x3e0] ss:$16 sps:$4 sm:$0xff]  }
  0x78   :  { %1324 = vmatmul.mubr.bf16.vlgmr.msra.gmra.mrb[0].mxu0 %v1993_v4  ;;  %1488 = vmatmul.mubr.bf16.vlgmr.msra.gmra.mrb[0].mxu1 %v1993_v4  ;;  %v2504_v4 = vld [vmem:[#allocation5 + $0x3e8] ss:$16 sps:$4 sm:$0xff]  }
  0x79   :  { %1333 = vmatpush1.bf16.msra.mxu0 %v2411_v5  ;;  %1497 = vmatpush1.bf16.msra.mxu1 %v2414_v6  ;;  %v2511_v5 = vld [vmem:[#allocation5 + $0x404] ss:$16 sps:$4 sm:$0xff]   ;;  %v2514_v6 = vld [vmem:[#allocation5 + $0x40c] ss:$16 sps:$4 sm:$0xff]  }
  0x7a   :  { %1334 = vmatprep.subr.bf16.mxu0 %v2419_v7  ;;  %1498 = vmatprep.subr.bf16.mxu1 %v2422_v8  ;;  %v1995_v7 = vcombine.low %v2819_v29, %v2819_v29  ;;  %v2509_v8 = vld [vmem:[#allocation5 + $0x400] ss:$16 sps:$4 sm:$0xff]   ;;  %v2544_v29 = vld [vmem:[#allocation5 + $0x4ac] ss:$16 sps:$4 sm:$0xff]  }
  0x7b   :  { %1364 = vmatprep.mubr.bf16.mxu0 %v1996_v30  ;;  %1528 = vmatprep.mubr.bf16.mxu1 %v1996_v30  ;;  %v2539_v30 = vld [vmem:[#allocation5 + $0x4a0] ss:$16 sps:$4 sm:$0xff]  }
  0x7d   :  { %1335 = vmatpush1.bf16.msra.mxu0 %v2417_v9  ;;  %1499 = vmatpush1.bf16.msra.mxu1 %v2420_v10  ;;  %v2512_v9 = vld [vmem:[#allocation5 + $0x408] ss:$16 sps:$4 sm:$0xff]   ;;  %v2517_v10 = vld [vmem:[#allocation5 + $0x424] ss:$16 sps:$4 sm:$0xff]  }
  0x7e   :  { %1336 = vmatprep.subr.bf16.mxu0 %v2425_v11  ;;  %1500 = vmatprep.subr.bf16.mxu1 %v2428_v12  ;;  %v2825_v11 = vld [vmem:[#allocation2 + $0x10] sm:$0xff]  ;;  %v2520_v12 = vld [vmem:[#allocation5 + $0x42c] ss:$16 sps:$4 sm:$0xff]  }
  0x81   :  { %1337 = vmatpush1.bf16.msra.mxu0 %v2423_v13  ;;  %1501 = vmatpush1.bf16.msra.mxu1 %v2426_v14  ;;  %v1998_v13 = vcombine.high %v2825_v11, %v2825_v11  ;;  %v2515_v14 = vld [vmem:[#allocation5 + $0x420] ss:$16 sps:$4 sm:$0xff]  }
  0x82   :  { %1338 = vmatprep.subr.bf16.mxu0 %v2431_v15  ;;  %1502 = vmatprep.subr.bf16.mxu1 %v2434_v16  ;;  %v2518_v15 = vld [vmem:[#allocation5 + $0x428] ss:$16 sps:$4 sm:$0xff]   ;;  %v2523_v16 = vld [vmem:[#allocation5 + $0x444] ss:$16 sps:$4 sm:$0xff]  }
  0x85   :  { %1339 = vmatpush1.bf16.msra.mxu0 %v2429_v17  ;;  %1503 = vmatpush1.bf16.msra.mxu1 %v2432_v18  ;;  %v2526_v17 = vld [vmem:[#allocation5 + $0x44c] ss:$16 sps:$4 sm:$0xff]   ;;  %v2521_v18 = vld [vmem:[#allocation5 + $0x440] ss:$16 sps:$4 sm:$0xff]  }
  0x86   :  { %1340 = vmatprep.subr.bf16.mxu0 %v2437_v19  ;;  %1504 = vmatprep.subr.bf16.mxu1 %v2440_v20  ;;  %v2524_v19 = vld [vmem:[#allocation5 + $0x448] ss:$16 sps:$4 sm:$0xff]   ;;  %v2529_v20 = vld [vmem:[#allocation5 + $0x464] ss:$16 sps:$4 sm:$0xff]  }
  0x89   :  { %1341 = vmatpush1.bf16.msra.mxu0 %v2435_v21  ;;  %1505 = vmatpush1.bf16.msra.mxu1 %v2438_v22  ;;  %v2532_v21 = vld [vmem:[#allocation5 + $0x46c] ss:$16 sps:$4 sm:$0xff]   ;;  %v2527_v22 = vld [vmem:[#allocation5 + $0x460] ss:$16 sps:$4 sm:$0xff]  }
  0x8a   :  { %1342 = vmatprep.subr.bf16.mxu0 %v2443_v23  ;;  %1506 = vmatprep.subr.bf16.mxu1 %v2446_v24  ;;  %v2530_v23 = vld [vmem:[#allocation5 + $0x468] ss:$16 sps:$4 sm:$0xff]   ;;  %v2535_v24 = vld [vmem:[#allocation5 + $0x484] ss:$16 sps:$4 sm:$0xff]  }
  0x8d   :  { %1343 = vmatpush1.bf16.msra.mxu0 %v2441_v25  ;;  %1507 = vmatpush1.bf16.msra.mxu1 %v2444_v26  ;;  %v2538_v25 = vld [vmem:[#allocation5 + $0x48c] ss:$16 sps:$4 sm:$0xff]   ;;  %v2533_v26 = vld [vmem:[#allocation5 + $0x480] ss:$16 sps:$4 sm:$0xff]  }
  0x8e   :  { %1344 = vmatprep.subr.bf16.mxu0 %v2449_v27  ;;  %1508 = vmatprep.subr.bf16.mxu1 %v2452_v28  ;;  %v2536_v27 = vld [vmem:[#allocation5 + $0x488] ss:$16 sps:$4 sm:$0xff]   ;;  %v2541_v28 = vld [vmem:[#allocation5 + $0x4a4] ss:$16 sps:$4 sm:$0xff]  }
  0x91   :  { %1345 = vmatpush1.bf16.msra.mxu0 %v2447_v31  ;;  %1509 = vmatpush1.bf16.msra.mxu1 %v2450_v32  ;;  %v2542_v31 = vld [vmem:[#allocation5 + $0x4a8] ss:$16 sps:$4 sm:$0xff]   ;;  %v2547_v32 = vld [vmem:[#allocation5 + $0x4c4] ss:$16 sps:$4 sm:$0xff]  }
  0x92   :  { %1346 = vmatprep.subr.bf16.mxu0 %v2455_v33  ;;  %1510 = vmatprep.subr.bf16.mxu1 %v2458_v34  ;;  %v2550_v33 = vld [vmem:[#allocation5 + $0x4cc] ss:$16 sps:$4 sm:$0xff]   ;;  %v2545_v34 = vld [vmem:[#allocation5 + $0x4c0] ss:$16 sps:$4 sm:$0xff]  }
  0x95   :  { %1347 = vmatpush1.bf16.msra.mxu0 %v2453_v35  ;;  %1511 = vmatpush1.bf16.msra.mxu1 %v2456_v36  ;;  %v2548_v35 = vld [vmem:[#allocation5 + $0x4c8] ss:$16 sps:$4 sm:$0xff]   ;;  %v2553_v36 = vld [vmem:[#allocation5 + $0x4e4] ss:$16 sps:$4 sm:$0xff]  }
  0x96   :  { %1348 = vmatprep.subr.bf16.mxu0 %v2461_v37  ;;  %1512 = vmatprep.subr.bf16.mxu1 %v2464_v38  ;;  %v2556_v37 = vld [vmem:[#allocation5 + $0x4ec] ss:$16 sps:$4 sm:$0xff]   ;;  %v2551_v38 = vld [vmem:[#allocation5 + $0x4e0] ss:$16 sps:$4 sm:$0xff]  }
  0x99   :  { %1349 = vmatpush1.bf16.msra.mxu0 %v2459_v39  ;;  %1513 = vmatpush1.bf16.msra.mxu1 %v2462_v40  ;;  %v2554_v39 = vld [vmem:[#allocation5 + $0x4e8] ss:$16 sps:$4 sm:$0xff]   ;;  %v2559_v40 = vld [vmem:[#allocation5 + $0x504] ss:$16 sps:$4 sm:$0xff]  }
  0x9a   :  { %1350 = vmatprep.subr.bf16.mxu0 %v2467_v41  ;;  %1514 = vmatprep.subr.bf16.mxu1 %v2470_v42  ;;  %v2562_v41 = vld [vmem:[#allocation5 + $0x50c] ss:$16 sps:$4 sm:$0xff]   ;;  %v2557_v42 = vld [vmem:[#allocation5 + $0x500] ss:$16 sps:$4 sm:$0xff]  }
  0x9d   :  { %1351 = vmatpush1.bf16.msra.mxu0 %v2465_v43  ;;  %1515 = vmatpush1.bf16.msra.mxu1 %v2468_v44  ;;  %v2560_v43 = vld [vmem:[#allocation5 + $0x508] ss:$16 sps:$4 sm:$0xff]   ;;  %v2565_v44 = vld [vmem:[#allocation5 + $0x524] ss:$16 sps:$4 sm:$0xff]  }
  0x9e   :  { %1352 = vmatprep.subr.bf16.mxu0 %v2473_v45  ;;  %1516 = vmatprep.subr.bf16.mxu1 %v2476_v46  ;;  %v2568_v45 = vld [vmem:[#allocation5 + $0x52c] ss:$16 sps:$4 sm:$0xff]   ;;  %v2563_v46 = vld [vmem:[#allocation5 + $0x520] ss:$16 sps:$4 sm:$0xff]  }
  0xa1   :  { %1353 = vmatpush1.bf16.msra.mxu0 %v2471_v47  ;;  %1517 = vmatpush1.bf16.msra.mxu1 %v2474_v48  ;;  %v2566_v47 = vld [vmem:[#allocation5 + $0x528] ss:$16 sps:$4 sm:$0xff]   ;;  %v2571_v48 = vld [vmem:[#allocation5 + $0x544] ss:$16 sps:$4 sm:$0xff]  }
  0xa2   :  { %1354 = vmatprep.subr.bf16.mxu0 %v2479_v49  ;;  %1518 = vmatprep.subr.bf16.mxu1 %v2482_v50  ;;  %v2574_v49 = vld [vmem:[#allocation5 + $0x54c] ss:$16 sps:$4 sm:$0xff]   ;;  %v2569_v50 = vld [vmem:[#allocation5 + $0x540] ss:$16 sps:$4 sm:$0xff]  }
  0xa5   :  { %1355 = vmatpush1.bf16.msra.mxu0 %v2477_v51  ;;  %1519 = vmatpush1.bf16.msra.mxu1 %v2480_v52  ;;  %v2572_v51 = vld [vmem:[#allocation5 + $0x548] ss:$16 sps:$4 sm:$0xff]   ;;  %v2577_v52 = vld [vmem:[#allocation5 + $0x564] ss:$16 sps:$4 sm:$0xff]  }
  0xa6   :  { %1356 = vmatprep.subr.bf16.mxu0 %v2485_v53  ;;  %1520 = vmatprep.subr.bf16.mxu1 %v2488_v54  ;;  %v2580_v53 = vld [vmem:[#allocation5 + $0x56c] ss:$16 sps:$4 sm:$0xff]   ;;  %v2575_v54 = vld [vmem:[#allocation5 + $0x560] ss:$16 sps:$4 sm:$0xff]  }
  0xa9   :  { %1357 = vmatpush1.bf16.msra.mxu0 %v2483_v55  ;;  %1521 = vmatpush1.bf16.msra.mxu1 %v2486_v56  ;;  %v2578_v55 = vld [vmem:[#allocation5 + $0x568] ss:$16 sps:$4 sm:$0xff]   ;;  %v2583_v56 = vld [vmem:[#allocation5 + $0x584] ss:$16 sps:$4 sm:$0xff]  }
  0xaa   :  { %1358 = vmatprep.subr.bf16.mxu0 %v2491_v57  ;;  %1522 = vmatprep.subr.bf16.mxu1 %v2494_v58  ;;  %v2586_v57 = vld [vmem:[#allocation5 + $0x58c] ss:$16 sps:$4 sm:$0xff]   ;;  %v2581_v58 = vld [vmem:[#allocation5 + $0x580] ss:$16 sps:$4 sm:$0xff]  }
  0xad   :  { %1359 = vmatpush1.bf16.msra.mxu0 %v2489_v59  ;;  %1523 = vmatpush1.bf16.msra.mxu1 %v2492_v60  ;;  %v2584_v59 = vld [vmem:[#allocation5 + $0x588] ss:$16 sps:$4 sm:$0xff]   ;;  %v2589_v60 = vld [vmem:[#allocation5 + $0x5a4] ss:$16 sps:$4 sm:$0xff]  }
  0xae   :  { %1360 = vmatprep.subr.bf16.mxu0 %v2497_v61  ;;  %1524 = vmatprep.subr.bf16.mxu1 %v2500_v62  ;;  %v2592_v61 = vld [vmem:[#allocation5 + $0x5ac] ss:$16 sps:$4 sm:$0xff]   ;;  %v2587_v62 = vld [vmem:[#allocation5 + $0x5a0] ss:$16 sps:$4 sm:$0xff]  }
  0xb1   :  { %1361 = vmatpush1.bf16.msra.mxu0 %v2495_v63  ;;  %1525 = vmatpush1.bf16.msra.mxu1 %v2498_v0  ;;  %v2590_v63 = vld [vmem:[#allocation5 + $0x5a8] ss:$16 sps:$4 sm:$0xff]   ;;  %v2595_v0 = vld [vmem:[#allocation5 + $0x5c4] ss:$16 sps:$4 sm:$0xff]  }
  0xb2   :  { %1362 = vmatprep.subr.bf16.mxu0 %v2503_v1  ;;  %1526 = vmatprep.subr.bf16.mxu1 %v2506_v2  ;;  %v2598_v1 = vld [vmem:[#allocation5 + $0x5cc] ss:$16 sps:$4 sm:$0xff]   ;;  %v2593_v2 = vld [vmem:[#allocation5 + $0x5c0] ss:$16 sps:$4 sm:$0xff]  }
  0xb5   :  { %1363 = vmatpush1.bf16.msra.mxu0 %v2501_v3  ;;  %1527 = vmatpush1.bf16.msra.mxu1 %v2504_v4  ;;  %v2596_v3 = vld [vmem:[#allocation5 + $0x5c8] ss:$16 sps:$4 sm:$0xff]   ;;  %v2601_v4 = vld [vmem:[#allocation5 + $0x5e4] ss:$16 sps:$4 sm:$0xff]  }
  0xb6   :  { %1373 = vmatprep.subr.bf16.mxu0 %v2511_v5  ;;  %1537 = vmatprep.subr.bf16.mxu1 %v2514_v6  ;;  %v2604_v5 = vld [vmem:[#allocation5 + $0x5ec] ss:$16 sps:$4 sm:$0xff]   ;;  %v2599_v6 = vld [vmem:[#allocation5 + $0x5e0] ss:$16 sps:$4 sm:$0xff]  }
  0xb8   :  { %1365 = vmatmul.mubr.bf16.vlgmr.msra.gmra.mrb[0].mxu0 %v1995_v7  ;;  %1529 = vmatmul.mubr.bf16.vlgmr.msra.gmra.mrb[0].mxu1 %v1995_v7  ;;  %v2602_v7 = vld [vmem:[#allocation5 + $0x5e8] ss:$16 sps:$4 sm:$0xff]  }
  0xb9   :  { %1374 = vmatpush1.bf16.msra.mxu0 %v2509_v8  ;;  %1538 = vmatpush1.bf16.msra.mxu1 %v2512_v9  ;;  %v2609_v8 = vld [vmem:[#allocation5 + $0x604] ss:$16 sps:$4 sm:$0xff]   ;;  %v2612_v9 = vld [vmem:[#allocation5 + $0x60c] ss:$16 sps:$4 sm:$0xff]  }
  0xba   :  { %1375 = vmatprep.subr.bf16.mxu0 %v2517_v10  ;;  %1539 = vmatprep.subr.bf16.mxu1 %v2520_v12  ;;  %v1997_v10 = vcombine.low %v2825_v11, %v2825_v11  ;;  %v2607_v12 = vld [vmem:[#allocation5 + $0x600] ss:$16 sps:$4 sm:$0xff]  }
  0xbb   :  { %1405 = vmatprep.mubr.bf16.mxu0 %v1998_v13  ;;  %1569 = vmatprep.mubr.bf16.mxu1 %v1998_v13  ;;  %v2610_v13 = vld [vmem:[#allocation5 + $0x608] ss:$16 sps:$4 sm:$0xff]   ;;  %v2616_v11 = vld [vmem:[#allocation7] sm:$0xff]  }
  0xbd   :  { %1376 = vmatpush1.bf16.msra.mxu0 %v2515_v14  ;;  %1540 = vmatpush1.bf16.msra.mxu1 %v2518_v15  ;;  %v2614_v14 = vld [vmem:[#allocation7 + $0x40] sm:$0xff]  }
  0xbe   :  { %1377 = vmatprep.subr.bf16.mxu0 %v2523_v16  ;;  %1541 = vmatprep.subr.bf16.mxu1 %v2526_v17  ;;  %v2615_v15 = vld [vmem:[#allocation7 + $0xc0] sm:$0xff]   ;;  %v2751_v16 = vmov 0   ;;  %v2613_v17 = vld [vmem:[#allocation2 + $0x18] ss:$0 sps:$4 sm:$0xff]  }
  0xc1   :  { %1378 = vmatpush1.bf16.msra.mxu0 %v2521_v18  ;;  %1542 = vmatpush1.bf16.msra.mxu1 %v2524_v19  ;;  %v2617_v18 = vld [vmem:[#allocation7 + $0x80] sm:$0xff]   ;;  %v2618_v19 = vld [vmem:[#allocation7 + $0x48] sm:$0xff]  }
  0xc2   :  { %1379 = vmatprep.subr.bf16.mxu0 %v2529_v20  ;;  %1543 = vmatprep.subr.bf16.mxu1 %v2532_v21  ;;  %v2619_v20 = vld [vmem:[#allocation7 + $0xc8] sm:$0xff]  }
  0xc3   :  { %v2620_v21 = vld [vmem:[#allocation7 + $0x8] sm:$0xff]  }
  0xc5   :  { %1380 = vmatpush1.bf16.msra.mxu0 %v2527_v22  ;;  %1544 = vmatpush1.bf16.msra.mxu1 %v2530_v23  ;;  %v2621_v22 = vld [vmem:[#allocation7 + $0x88] sm:$0xff]   ;;  %v2622_v23 = vld [vmem:[#allocation7 + $0x50] sm:$0xff]  }
  0xc6   :  { %1381 = vmatprep.subr.bf16.mxu0 %v2535_v24  ;;  %1545 = vmatprep.subr.bf16.mxu1 %v2538_v25  ;;  %v2623_v24 = vld [vmem:[#allocation7 + $0xd0] sm:$0xff]  }
  0xc7   :  { %v2624_v25 = vld [vmem:[#allocation7 + $0x10] sm:$0xff]  }
  0xc9   :  { %1382 = vmatpush1.bf16.msra.mxu0 %v2533_v26  ;;  %1546 = vmatpush1.bf16.msra.mxu1 %v2536_v27  ;;  %v2625_v26 = vld [vmem:[#allocation7 + $0x90] sm:$0xff]   ;;  %v2626_v27 = vld [vmem:[#allocation7 + $0x58] sm:$0xff]  }
  0xca   :  { %1383 = vmatprep.subr.bf16.mxu0 %v2541_v28  ;;  %1547 = vmatprep.subr.bf16.mxu1 %v2544_v29  ;;  %v2627_v28 = vld [vmem:[#allocation7 + $0xd8] sm:$0xff]  }
  0xcb   :  { %v2628_v29 = vld [vmem:[#allocation7 + $0x18] sm:$0xff]  }
  0xcd   :  { %1384 = vmatpush1.bf16.msra.mxu0 %v2539_v30  ;;  %1548 = vmatpush1.bf16.msra.mxu1 %v2542_v31  ;;  %v2629_v30 = vld [vmem:[#allocation7 + $0x98] sm:$0xff]   ;;  %v2630_v31 = vld [vmem:[#allocation7 + $0x60] sm:$0xff]  }
  0xce   :  { %1385 = vmatprep.subr.bf16.mxu0 %v2547_v32  ;;  %1549 = vmatprep.subr.bf16.mxu1 %v2550_v33  ;;  %v2631_v32 = vld [vmem:[#allocation7 + $0xe0] sm:$0xff]  }
  0xcf   :  { %v2632_v33 = vld [vmem:[#allocation7 + $0x20] sm:$0xff]  }
  0xd1   :  { %1386 = vmatpush1.bf16.msra.mxu0 %v2545_v34  ;;  %1550 = vmatpush1.bf16.msra.mxu1 %v2548_v35  ;;  %v2633_v34 = vld [vmem:[#allocation7 + $0xa0] sm:$0xff]   ;;  %v2634_v35 = vld [vmem:[#allocation7 + $0x68] sm:$0xff]  }
  0xd2   :  { %1387 = vmatprep.subr.bf16.mxu0 %v2553_v36  ;;  %1551 = vmatprep.subr.bf16.mxu1 %v2556_v37  ;;  %v2635_v36 = vld [vmem:[#allocation7 + $0xe8] sm:$0xff]  }
  0xd3   :  { %v2636_v37 = vld [vmem:[#allocation7 + $0x28] sm:$0xff]  }
  0xd5   :  { %1388 = vmatpush1.bf16.msra.mxu0 %v2551_v38  ;;  %1552 = vmatpush1.bf16.msra.mxu1 %v2554_v39  ;;  %v2637_v38 = vld [vmem:[#allocation7 + $0xa8] sm:$0xff]   ;;  %v2638_v39 = vld [vmem:[#allocation7 + $0x70] sm:$0xff]  }
  0xd6   :  { %1389 = vmatprep.subr.bf16.mxu0 %v2559_v40  ;;  %1553 = vmatprep.subr.bf16.mxu1 %v2562_v41  ;;  %v2639_v40 = vld [vmem:[#allocation7 + $0xf0] sm:$0xff]  }
  0xd7   :  { %v2640_v41 = vld [vmem:[#allocation7 + $0x30] sm:$0xff]  }
  0xd9   :  { %1390 = vmatpush1.bf16.msra.mxu0 %v2557_v42  ;;  %1554 = vmatpush1.bf16.msra.mxu1 %v2560_v43  ;;  %v2641_v42 = vld [vmem:[#allocation7 + $0xb0] sm:$0xff]   ;;  %v2642_v43 = vld [vmem:[#allocation7 + $0x78] sm:$0xff]  }
  0xda   :  { %1391 = vmatprep.subr.bf16.mxu0 %v2565_v44  ;;  %1555 = vmatprep.subr.bf16.mxu1 %v2568_v45  ;;  %v2643_v44 = vld [vmem:[#allocation7 + $0xf8] sm:$0xff]  }
  0xdb   :  { %v2644_v45 = vld [vmem:[#allocation7 + $0x38] sm:$0xff]  }
  0xdd   :  { %1392 = vmatpush1.bf16.msra.mxu0 %v2563_v46  ;;  %1556 = vmatpush1.bf16.msra.mxu1 %v2566_v47  ;;  %v2645_v46 = vld [vmem:[#allocation7 + $0xb8] sm:$0xff]   ;;  %v263_v47 = vlaneseq }
  0xde   :  { %1393 = vmatprep.subr.bf16.mxu0 %v2571_v48  ;;  %1557 = vmatprep.subr.bf16.mxu1 %v2574_v49 }
  0xdf   :  { %v264_v48 = vshrl.u32 %v263_v47, 7 }
  0xe1   :  { %1394 = vmatpush1.bf16.msra.mxu0 %v2569_v50  ;;  %1558 = vmatpush1.bf16.msra.mxu1 %v2572_v51  ;;  %v265_v49 = vsub.s32 0, %v264_v48  ;;  %v273_v50 = vsub.s32 2, %v264_v48  ;;  %v261_v51 = vld [vmem:[%s2851_s2] sm:$0xf] }
  0xe2   :  { %1395 = vmatprep.subr.bf16.mxu0 %v2577_v52  ;;  %1559 = vmatprep.subr.bf16.mxu1 %v2580_v53  ;;  %v269_v52 = vsub.s32 1, %v264_v48  ;;  %v277_v53 = vsub.s32 3, %v264_v48 }
  0xe5   :  { %1396 = vmatpush1.bf16.msra.mxu0 %v2575_v54  ;;  %1560 = vmatpush1.bf16.msra.mxu1 %v2578_v55  ;;  %v266_v54 = vrot.slane %v261_v51, %v265_v49  ;;  %v274_v55 = vrot.slane %v261_v51, %v273_v50 }
  0xe6   :  { %1397 = vmatprep.subr.bf16.mxu0 %v2583_v56  ;;  %1561 = vmatprep.subr.bf16.mxu1 %v2586_v57  ;;  %v270_v56 = vrot.slane %v261_v51, %v269_v52  ;;  %v278_v57 = vrot.slane %v261_v51, %v277_v53 }
  0xe9   :  { %1398 = vmatpush1.bf16.msra.mxu0 %v2581_v58  ;;  %1562 = vmatpush1.bf16.msra.mxu1 %v2584_v59 }
  0xea   :  { %1399 = vmatprep.subr.bf16.mxu0 %v2589_v60  ;;  %1563 = vmatprep.subr.bf16.mxu1 %v2592_v61 }
  0xed   :  { %1400 = vmatpush1.bf16.msra.mxu0 %v2587_v62  ;;  %1564 = vmatpush1.bf16.msra.mxu1 %v2590_v63 }
  0xee   :  { %1401 = vmatprep.subr.bf16.mxu0 %v2595_v0  ;;  %1565 = vmatprep.subr.bf16.mxu1 %v2598_v1 }
  0xf1   :  { %1402 = vmatpush1.bf16.msra.mxu0 %v2593_v2  ;;  %1566 = vmatpush1.bf16.msra.mxu1 %v2596_v3 }
  0xf2   :  { %1403 = vmatprep.subr.bf16.mxu0 %v2601_v4  ;;  %1567 = vmatprep.subr.bf16.mxu1 %v2604_v5 }
  0xf5   :  { %1404 = vmatpush1.bf16.msra.mxu0 %v2599_v6  ;;  %1568 = vmatpush1.bf16.msra.mxu1 %v2602_v7 }
  0xf6   :  { %1414 = vmatprep.subr.bf16.mxu0 %v2609_v8  ;;  %1578 = vmatprep.subr.bf16.mxu1 %v2612_v9 }
  0xf8   :  { %1406 = vmatmul.mubr.bf16.vlgmr.msra.gmra.mrb[0].mxu0 %v1997_v10  ;;  %1570 = vmatmul.mubr.bf16.vlgmr.msra.gmra.mrb[0].mxu1 %v1997_v10 }
  0xf9   :  { %1415 = vmatpush1.bf16.msra.mxu0 %v2607_v12  ;;  %1579 = vmatpush1.bf16.msra.mxu1 %v2610_v13 }
  0xfa   :  { %1446 = vmatprep.mubr.bf16.mxu0 %v2751_v16  ;;  %1610 = vmatprep.mubr.bf16.mxu1 %v2751_v16 }
  0xfb   :  { %2232 = vmatprep.subr.bf16.mxu0 %v2614_v14  ;;  %2254 = vmatprep.subr.bf16.mxu1 %v2615_v15 }
 0x104   :  { %2196 = vmatmul.mubr.msk.bf16.vlgmr.msra.gmra.mrb[0].mxu0 %vm1287_vm0, %v2613_v17  ;;  %2197 = vmatmul.mubr.msk.bf16.vlgmr.msra.gmra.mrb[0].mxu1 %vm1287_vm0, %v2613_v17  ;;  %v2198_v17 = vld [vmem:[%s2853_s4] ss:$0 sm:$0xff]  ;;  %s2716_s4 = scalar_lea.vmem %s1984_s9, 128 }
 0x105   :  { %2233 = vmatpush3.bf16.msra.mxu0 %v2616_v11  ;;  %2255 = vmatpush3.bf16.msra.mxu1 %v2617_v18  ;;  %p2717_p10 = scmp.ne.s32.totalorder %s1984_s9, %s2716_s4  ;;  %p2722_p12 = scmp.lt.s32.totalorder %s2716_s4, %s2716_s4 }
 0x106   :  { %2234 = vmatprep.subr.bf16.mxu0 %v2618_v19  ;;  %2256 = vmatprep.subr.bf16.mxu1 %v2619_v20 }
 0x107   :  { %p2723_p13 = por %p2722_p12, %p2721_p11 }
 0x109   :  { %2235 = vmatpush3.bf16.msra.mxu0 %v2620_v21  ;;  %2257 = vmatpush3.bf16.msra.mxu1 %v2621_v22  ;;  %p2724_p0 = pnand %p2723_p13, %p2717_p10 }
 0x10a   :  { %2236 = vmatprep.subr.bf16.mxu0 %v2622_v23  ;;  %2258 = vmatprep.subr.bf16.mxu1 %v2623_v24 }
 0x10d   :  { %2237 = vmatpush3.bf16.msra.mxu0 %v2624_v25  ;;  %2259 = vmatpush3.bf16.msra.mxu1 %v2625_v26 }
 0x10e   :  { %2238 = vmatprep.subr.bf16.mxu0 %v2626_v27  ;;  %2260 = vmatprep.subr.bf16.mxu1 %v2627_v28 }
 0x111   :  { %2239 = vmatpush3.bf16.msra.mxu0 %v2628_v29  ;;  %2261 = vmatpush3.bf16.msra.mxu1 %v2629_v30 }
 0x112   :  { %2240 = vmatprep.subr.bf16.mxu0 %v2630_v31  ;;  %2262 = vmatprep.subr.bf16.mxu1 %v2631_v32 }
 0x115   :  { %2241 = vmatpush3.bf16.msra.mxu0 %v2632_v33  ;;  %2263 = vmatpush3.bf16.msra.mxu1 %v2633_v34 }
 0x116   :  { %2242 = vmatprep.subr.bf16.mxu0 %v2634_v35  ;;  %2264 = vmatprep.subr.bf16.mxu1 %v2635_v36 }
 0x119   :  { %2243 = vmatpush3.bf16.msra.mxu0 %v2636_v37  ;;  %2265 = vmatpush3.bf16.msra.mxu1 %v2637_v38 }
 0x11a   :  { %2244 = vmatprep.subr.bf16.mxu0 %v2638_v39  ;;  %2266 = vmatprep.subr.bf16.mxu1 %v2639_v40 }
 0x11d   :  { %2245 = vmatpush3.bf16.msra.mxu0 %v2640_v41  ;;  %2267 = vmatpush3.bf16.msra.mxu1 %v2641_v42 }
 0x11e   :  { %2246 = vmatprep.subr.bf16.mxu0 %v2642_v43  ;;  %2268 = vmatprep.subr.bf16.mxu1 %v2643_v44 }
 0x121   :  { %2247 = vmatpush3.bf16.msra.mxu0 %v2644_v45  ;;  %2269 = vmatpush3.bf16.msra.mxu1 %v2645_v46 }
 0x1d7   :  { %v1448_v58 = vpop.f32.mrb[0].mxu0  ;;  %v1612_v59 = vpop.f32.mrb[0].mxu1 }
 0x1d8   :  { %v2276_v60 = vadd.f32 %v1448_v58, %v266_v54  ;;  %v2278_v61 = vadd.f32 %v1612_v59, %v274_v55  ;;  %v1450_v62 = vpop.f32.mrb[1].mxu0  ;;  %v1614_v63 = vpop.f32.mrb[1].mxu1 }
 0x1d9   :  { %v2277_v0 = vadd.f32 %v1450_v62, %v270_v56  ;;  %v2279_v1 = vadd.f32 %v1614_v63, %v278_v57  ;;  %v1452_v2 = vpop.f32.mrb[2].mxu0  ;;  %v1616_v3 = vpop.f32.mrb[2].mxu1 }
 0x1da   :  { %v1619_v4 = vmax.f32 %v2276_v60, 0.0  ;;  %v1621_v5 = vmax.f32 %v2278_v61, 0.0  ;;  %v1453_v6 = vpop.f32.mrb[3].mxu0  ;;  %v1617_v7 = vpop.f32.mrb[3].mxu1 }
 0x1db   :  { %v1620_v8 = vmax.f32 %v2277_v0, 0.0  ;;  %v1622_v9 = vmax.f32 %v2279_v1, 0.0 }
 0x1dc   :  { %v1623_v13 = vpack.c.bf16 %v1619_v4, %v1619_v4  ;;  %v1625_v14 = vpack.c.bf16 %v1621_v5, %v1621_v5 }
 0x1dd   :  { %v1624_v10 = vpack.c.bf16 %v1620_v8, %v1620_v8  ;;  %v1626_v12 = vpack.c.bf16 %v1622_v9, %v1622_v9 }
 0x1df   :  { %1922 = vmatprep.mubr.bf16.mxu0 %v1624_v10  ;;  %1962 = vmatprep.mubr.bf16.mxu1 %v1626_v12 }
 0x1e0   :  { %1923 = vmatmul.mubr.bf16.vlgmr.msra.gmra.mrb[4].mxu0 %v1623_v13  ;;  %1963 = vmatmul.mubr.bf16.vlgmr.msra.gmra.mrb[4].mxu1 %v1625_v14 }
 0x2b3   :  { %v2248_v15 = vpop.f32.mrb[4].mxu0  ;;  %v2270_v16 = vpop.f32.mrb[4].mxu1 }
 0x2b4   :  { %v2249_v11 = vpop.f32.mrb[5].mxu0  ;;  %v2271_v18 = vpop.f32.mrb[5].mxu1 }
 0x2b5   :  { %v2250_v19 = vadd.f32 %v2249_v11, %v2248_v15  ;;  %v2272_v20 = vadd.f32 %v2271_v18, %v2270_v16  ;;  %v2251_v21 = vpop.f32.mrb[6].mxu0  ;;  %v2273_v22 = vpop.f32.mrb[6].mxu1 }
 0x2b6   :  { %v2252_v23 = vpop.f32.mrb[7].mxu0  ;;  %v2274_v24 = vpop.f32.mrb[7].mxu1 }
 0x2b7   :  { %v1925_v25 = vadd.f32 %v2250_v19, %v2198_v17 }
 0x2b9   :  { %v1965_v26 = vadd.f32 %v2272_v20, %v1925_v25 }
 0x2bb   :  { %v2231_v27 = vmul.f32 -1.442695, %v1965_v26 }
 0x2bd   :  { %2646 = vpow2.f32 %v2231_v27 }
 0x2c7   :  { %v2647_v28 = vpop.eup %2646 }
 0x2c8   :  { %v1973_v29 = vadd.f32 1.0, %v2647_v28 }
 0x2ca   :  { %2648 = vrcp.f32 %v1973_v29 }
 0x2d4   :  { %v2649_v30 = vpop.eup %2648 }
 0x2d5   :  { %1976 = vst [vmem:[#allocation8] sm:$0xff] %v2649_v30 }
 0x2d6   :  { %2727 = shalt.err (!%p2724_p0)
}
 0x2d7   :  { %s2728_s12 = scalar_lea.hbm %s2854_s5, 128 }
 0x2d8   :  { %p2729_p1 = scmp.ne.s32.totalorder %s2854_s5, %s2728_s12  ;;  %p2732_p2 = scmp.lt.u32.totalorder %s2728_s12, %s2854_s5 }
 0x2da   :  { %p2734_p3 = pnand %p2732_p2, %p2729_p1 }
 0x2dc   :  { %2737 = shalt.err (!%p2734_p3)
}
 0x2dd   :  { %1986 = dma.vmem_to_hbm [thread:$0]  %s1984_s9, 128, %s2854_s5, [#allocation4]  }
 0x2de   :  { %2742 = dma.done.wait [#allocation4], 128  }
 0x2df   :  { %2743 = vsyncadd [#allocation4], 4294967168 }
 0x2e0   :  { %1990 = vsyncpa [#allocation3], 1 }
 0x2e1   :  { %1991 = vsyncpa [#allocation6], 1 }
 0x2e2   :  { %1992 = vsyncpa [#allocation4], 1 }

</bundles_post_ra>
